<compile_context>
chip_gen: v5e
topology: v5e:2x2
jax: 0.10.0
libtpu: 0.0.40
codegen_flags: <defaults>
</compile_context>

<pallas_src>
import functools

import numpy as np
import jax
import jax.numpy as jnp
from jax.experimental import pallas as pl
from jax.experimental.pallas import tpu as pltpu


# ----------------------------- Pallas kernel --------------------------------

def pnn_kernel(z_ref, a_ref, b_ref, wz_ref, wp_ref, b1_ref,
               wm1_ref, bm1_ref, wm2_ref, bm2_ref, wm3_ref, bm3_ref,
               out_ref):
    """One batch tile of the PNN forward pass (all matmuls on the MXU)."""
    z = z_ref[...]                                                   # (bb, F*D) bf16

    # InnerProductNetwork via MXU: gather both sides of every pair with 0/1
    # selection matmuls, multiply on the VPU (f32), reduce over D inside the
    # next matmul.  No lane slicing / cross-lane reductions / concatenation.
    za = jnp.dot(z, a_ref[...], preferred_element_type=jnp.float32)  # (bb, P*D)
    zb = jnp.dot(z, b_ref[...], preferred_element_type=jnp.float32)  # (bb, P*D)
    q = (za * zb).astype(jnp.bfloat16)                               # e_i * e_j products

    # First layer: l_z + l_p + folded biases, then ReLU.
    h = (jnp.dot(z, wz_ref[...], preferred_element_type=jnp.float32)
         + jnp.dot(q, wp_ref[...], preferred_element_type=jnp.float32)
         + b1_ref[...])
    h = jnp.maximum(h, 0.0).astype(jnp.bfloat16)

    # MLP (eval mode: BatchNorm/Dropout are identity) + final sigmoid.
    h = jnp.dot(h, wm1_ref[...], preferred_element_type=jnp.float32) + bm1_ref[...]
    h = jnp.maximum(h, 0.0).astype(jnp.bfloat16)
    h = jnp.dot(h, wm2_ref[...], preferred_element_type=jnp.float32) + bm2_ref[...]
    h = jnp.maximum(h, 0.0).astype(jnp.bfloat16)
    logit = jnp.dot(h, wm3_ref[...], preferred_element_type=jnp.float32) + bm3_ref[...]
    out_ref[...] = jax.nn.sigmoid(logit)


# ------------------------------ JAX wrapper ---------------------------------

def _round_up(x, m):
    return (x + m - 1) // m * m


def pnn_forward(params, x_user, x_item, user_hist=None, hist_len=None,
                ubr_hist=None, ubr_hist_len=None, *, block_b=2048):
    """Mirrors PNN.forward; returns sigmoid(y.squeeze(1)) of shape (B,)."""
    emb_table = params["embedding"].astype(jnp.bfloat16)   # bf16 table -> bf16 gather
    D = emb_table.shape[1]

    x = jnp.concatenate([x_user, x_item], axis=1)           # (B, F)
    B, F = x.shape
    P = F * (F - 1) // 2

    # Glue: embedding gather (FeaturesEmbedding), produced directly in bf16.
    z = jnp.take(emb_table, x, axis=0).reshape(B, F * D)    # (B, F*D) bf16

    # --- host-side static packing (one-time; weights stay VMEM-resident) ----
    pairs = [(i, j) for i in range(F) for j in range(i + 1, F)]
    a_np = np.zeros((F * D, P * D), np.float32)
    b_np = np.zeros((F * D, P * D), np.float32)
    eye_d = np.eye(D, dtype=np.float32)
    for k, (i, j) in enumerate(pairs):
        a_np[i * D:(i + 1) * D, k * D:(k + 1) * D] = eye_d
        b_np[j * D:(j + 1) * D, k * D:(k + 1) * D] = eye_d
    a_sel = jnp.asarray(a_np, jnp.bfloat16)
    b_sel = jnp.asarray(b_np, jnp.bfloat16)

    wz, bz = params["linear_z"]["w"], params["linear_z"]["b"]
    wp, bp = params["linear_p"]["w"], params["linear_p"]["b"]
    d1 = wz.shape[0]
    wz_t = wz.T.astype(jnp.bfloat16)                              # (F*D, d1)
    wp_exp = jnp.repeat(wp.T, D, axis=0).astype(jnp.bfloat16)     # (P*D, d1)
    b1 = (bz + bp + params["bias"]).reshape(1, d1).astype(jnp.float32)
    m = params["mlp"]
    wm1 = m["w1"].T.astype(jnp.bfloat16); bm1 = m["b1"].reshape(1, -1).astype(jnp.float32)
    wm2 = m["w2"].T.astype(jnp.bfloat16); bm2 = m["b2"].reshape(1, -1).astype(jnp.float32)
    wm3 = m["w3"].T.astype(jnp.bfloat16); bm3 = m["b3"].reshape(1, -1).astype(jnp.float32)
    h1, h2 = wm1.shape[1], wm2.shape[1]

    # --- batch tiling --------------------------------------------------------
    B8 = _round_up(B, 8)                   # never run with a 2-row sublane-masked tile
    bb = min(_round_up(block_b, 8), B8)
    # v7x has 2 TensorCores: keep >= 2 grid steps for the "parallel" batch axis
    # (no-op for tiny batches; single huge tiles are fine on 1-TC v5e/v6e too,
    # but splitting costs nothing there).
    if bb == B8 and B8 >= 16:
        bb = _round_up(B8 // 2, 8)
    Bp = _round_up(B8, bb)
    if Bp != B:
        z = jnp.pad(z, ((0, Bp - B), (0, 0)))
    grid = (Bp // bb,)

    def full_spec(a):
        return pl.BlockSpec(a.shape, lambda i, _nd=a.ndim: (0,) * _nd)

    weights = (a_sel, b_sel, wz_t, wp_exp, b1, wm1, bm1, wm2, bm2, wm3, bm3)

    # Advisory cost estimate so XLA overlaps the gather/pack glue with the kernel.
    flops = 2 * Bp * (2 * (F * D) * (P * D) + (F * D) * d1 + (P * D) * d1
                      + d1 * h1 + h1 * h2 + h2 * 1)
    bytes_accessed = (z.size * z.dtype.itemsize
                      + sum(w.size * w.dtype.itemsize for w in weights)
                      + Bp * 4)
    cost = pl.CostEstimate(flops=int(flops), transcendentals=int(Bp),
                           bytes_accessed=int(bytes_accessed))

    out = pl.pallas_call(
        pnn_kernel,
        out_shape=jax.ShapeDtypeStruct((Bp, 1), jnp.float32),
        grid=grid,
        in_specs=[pl.BlockSpec((bb, F * D), lambda i: (i, 0))]
                 + [full_spec(w) for w in weights],
        out_specs=pl.BlockSpec((bb, 1), lambda i: (i, 0)),
        compiler_params=pltpu.CompilerParams(dimension_semantics=("parallel",)),
        cost_estimate=cost,
    )(z, *weights)

    return out[:B, 0]


# --------------------------- pure-JAX reference -----------------------------

def pnn_reference(params, x_user, x_item):
    """Pure-JAX reference in the PyTorch PNN structure.

    It mirrors the kernel's bf16 staging points (embeddings, pairwise products,
    weights, inter-layer activations) with f32 accumulation, so the remaining
    kernel-vs-reference differences are f32 accumulation-order noise only.
    """
    f32 = jnp.float32
    qz = lambda a: a.astype(jnp.bfloat16).astype(f32)
    dot = functools.partial(jnp.dot, precision=jax.lax.Precision.HIGHEST,
                            preferred_element_type=f32)

    emb_table = params["embedding"].astype(jnp.bfloat16)
    D = emb_table.shape[1]
    x = jnp.concatenate([x_user, x_item], axis=1)
    B, F = x.shape
    emb = jnp.take(emb_table, x, axis=0).astype(f32)          # (B, F, D)
    z = emb.reshape(B, F * D)

    cols = []
    for i in range(F):
        for j in range(i + 1, F):
            cols.append(jnp.sum(qz(emb[:, i, :] * emb[:, j, :]), -1, keepdims=True))
    p = jnp.concatenate(cols, axis=-1)                        # (B, P)

    l_z = dot(z, qz(params["linear_z"]["w"]).T) + params["linear_z"]["b"]
    l_p = dot(p, qz(params["linear_p"]["w"]).T) + params["linear_p"]["b"]
    h = jnp.maximum(l_z + l_p + params["bias"], 0.0)
    m = params["mlp"]
    h = jnp.maximum(dot(qz(h), qz(m["w1"]).T) + m["b1"], 0.0)
    h = jnp.maximum(dot(qz(h), qz(m["w2"]).T) + m["b2"], 0.0)
    y = dot(qz(h), qz(m["w3"]).T) + m["b3"]
    return jax.nn.sigmoid(y[:, 0])


# --------------------------------- main --------------------------------------

if __name__ == "__main__":
    # Small config consistent with the module's __init__.
    vocabulary_size = 50
    embed_dim = 8
    user_num_fields = 3
    item_num_fields = 2
    num_fields = user_num_fields + item_num_fields           # 5
    hidden_dims = (32, 16)
    d1 = hidden_dims[0]
    num_pairs = num_fields * (num_fields - 1) // 2            # 10

    key = jax.random.PRNGKey(0)
    ks = iter(jax.random.split(key, 32))

    def init(shape, scale=0.1):
        return scale * jax.random.normal(next(ks), shape, jnp.float32)

    params = dict(
        embedding=init((vocabulary_size, embed_dim), scale=0.5),
        linear_z=dict(w=init((d1, num_fields * embed_dim)), b=init((d1,))),
        linear_p=dict(w=init((d1, num_pairs)), b=init((d1,))),
        bias=init((d1,)),
        mlp=dict(
            w1=init((hidden_dims[0], d1)), b1=init((hidden_dims[0],)),
            w2=init((hidden_dims[1], hidden_dims[0])), b2=init((hidden_dims[1],)),
            w3=init((1, hidden_dims[1])), b3=init((1,)),
        ),
    )

    B = 2
    dk = iter(jax.random.split(jax.random.PRNGKey(1), 8))
    x_user = jax.random.randint(next(dk), (B, user_num_fields), 0, vocabulary_size)
    x_item = jax.random.randint(next(dk), (B, item_num_fields), 0, vocabulary_size)

    out = jax.block_until_ready(pnn_forward(params, x_user, x_item))
    ref = jax.block_until_ready(pnn_reference(params, x_user, x_item))

    assert out.shape == (B,)
    assert bool(jnp.all(jnp.isfinite(out)))
    assert bool(jnp.allclose(out, ref, rtol=1e-3, atol=1e-3)), (out, ref)
    print("KERNEL_OK")
</pallas_src>

<mosaic_0001>
module attributes {stable_mosaic.version = 11 : i64} {
  func.func @pnn_kernel(%arg0: i32, %arg1: memref<8x40xbf16, #tpu.memory_space<vmem>>, %arg2: memref<40x80xbf16, #tpu.memory_space<vmem>>, %arg3: memref<40x80xbf16, #tpu.memory_space<vmem>>, %arg4: memref<40x32xbf16, #tpu.memory_space<vmem>>, %arg5: memref<80x32xbf16, #tpu.memory_space<vmem>>, %arg6: memref<1x32xf32, #tpu.memory_space<vmem>>, %arg7: memref<32x32xbf16, #tpu.memory_space<vmem>>, %arg8: memref<1x32xf32, #tpu.memory_space<vmem>>, %arg9: memref<32x16xbf16, #tpu.memory_space<vmem>>, %arg10: memref<1x16xf32, #tpu.memory_space<vmem>>, %arg11: memref<16x1xbf16, #tpu.memory_space<vmem>>, %arg12: memref<1x1xf32, #tpu.memory_space<vmem>>, %arg13: memref<8x1xf32, #tpu.memory_space<vmem>>) attributes {dimension_semantics = [#tpu.dimension_semantics<parallel>], iteration_bounds = array<i64: 1>, scalar_prefetch = 0 : i64, scratch_operands = 0 : i64, tpu.core_type = #tpu.core_type<tc>, window_params = [{transform_indices = @transform_0, window_bounds = array<i64: 8, 40>}, {pipeline_mode = #tpu.pipeline_mode<synchronous>, transform_indices = @transform_1, window_bounds = array<i64: 40, 80>}, {pipeline_mode = #tpu.pipeline_mode<synchronous>, transform_indices = @transform_2, window_bounds = array<i64: 40, 80>}, {pipeline_mode = #tpu.pipeline_mode<synchronous>, transform_indices = @transform_3, window_bounds = array<i64: 40, 32>}, {pipeline_mode = #tpu.pipeline_mode<synchronous>, transform_indices = @transform_4, window_bounds = array<i64: 80, 32>}, {pipeline_mode = #tpu.pipeline_mode<synchronous>, transform_indices = @transform_5, window_bounds = array<i64: 1, 32>}, {pipeline_mode = #tpu.pipeline_mode<synchronous>, transform_indices = @transform_6, window_bounds = array<i64: 32, 32>}, {pipeline_mode = #tpu.pipeline_mode<synchronous>, transform_indices = @transform_7, window_bounds = array<i64: 1, 32>}, {pipeline_mode = #tpu.pipeline_mode<synchronous>, transform_indices = @transform_8, window_bounds = array<i64: 32, 16>}, {pipeline_mode = #tpu.pipeline_mode<synchronous>, transform_indices = @transform_9, window_bounds = array<i64: 1, 16>}, {pipeline_mode = #tpu.pipeline_mode<synchronous>, transform_indices = @transform_10, window_bounds = array<i64: 16, 1>}, {pipeline_mode = #tpu.pipeline_mode<synchronous>, transform_indices = @transform_11, window_bounds = array<i64: 1, 1>}, {transform_indices = @transform_12, window_bounds = array<i64: 8, 1>}]} {
    %c0 = arith.constant 0 : index
    %c0_0 = arith.constant 0 : index
    %0 = vector.load %arg1[%c0, %c0_0] : memref<8x40xbf16, #tpu.memory_space<vmem>>, vector<8x40xbf16>
    %c0_1 = arith.constant 0 : index
    %c0_2 = arith.constant 0 : index
    %1 = vector.load %arg2[%c0_1, %c0_2] : memref<40x80xbf16, #tpu.memory_space<vmem>>, vector<40x80xbf16>
    %cst = arith.constant dense<0.000000e+00> : vector<8x80xf32>
    %2 = tpu.matmul %0, %1, %cst {dimension_numbers = #tpu.dot_dimension_numbers<[1], [0], [0], [1], [0, 0, 1, 1], [], []>} : vector<8x40xbf16>, vector<40x80xbf16>, vector<8x80xf32> -> vector<8x80xf32>
    %c0_3 = arith.constant 0 : index
    %c0_4 = arith.constant 0 : index
    %3 = vector.load %arg3[%c0_3, %c0_4] : memref<40x80xbf16, #tpu.memory_space<vmem>>, vector<40x80xbf16>
    %cst_5 = arith.constant dense<0.000000e+00> : vector<8x80xf32>
    %4 = tpu.matmul %0, %3, %cst_5 {dimension_numbers = #tpu.dot_dimension_numbers<[1], [0], [0], [1], [0, 0, 1, 1], [], []>} : vector<8x40xbf16>, vector<40x80xbf16>, vector<8x80xf32> -> vector<8x80xf32>
    %5 = arith.mulf %2, %4 : vector<8x80xf32>
    %6 = arith.truncf %5 : vector<8x80xf32> to vector<8x80xbf16>
    %c0_6 = arith.constant 0 : index
    %c0_7 = arith.constant 0 : index
    %7 = vector.load %arg4[%c0_6, %c0_7] : memref<40x32xbf16, #tpu.memory_space<vmem>>, vector<40x32xbf16>
    %cst_8 = arith.constant dense<0.000000e+00> : vector<8x32xf32>
    %8 = tpu.matmul %0, %7, %cst_8 {dimension_numbers = #tpu.dot_dimension_numbers<[1], [0], [0], [1], [0, 0, 1, 1], [], []>} : vector<8x40xbf16>, vector<40x32xbf16>, vector<8x32xf32> -> vector<8x32xf32>
    %c0_9 = arith.constant 0 : index
    %c0_10 = arith.constant 0 : index
    %9 = vector.load %arg5[%c0_9, %c0_10] : memref<80x32xbf16, #tpu.memory_space<vmem>>, vector<80x32xbf16>
    %cst_11 = arith.constant dense<0.000000e+00> : vector<8x32xf32>
    %10 = tpu.matmul %6, %9, %cst_11 {dimension_numbers = #tpu.dot_dimension_numbers<[1], [0], [0], [1], [0, 0, 1, 1], [], []>} : vector<8x80xbf16>, vector<80x32xbf16>, vector<8x32xf32> -> vector<8x32xf32>
    %11 = arith.addf %8, %10 : vector<8x32xf32>
    %c0_12 = arith.constant 0 : index
    %c0_13 = arith.constant 0 : index
    %12 = vector.load %arg6[%c0_12, %c0_13] : memref<1x32xf32, #tpu.memory_space<vmem>>, vector<1x32xf32>
    %13 = vector.broadcast %12 : vector<1x32xf32> to vector<8x32xf32>
    %14 = arith.addf %11, %13 : vector<8x32xf32>
    %cst_14 = arith.constant 0.000000e+00 : f32
    %15 = vector.broadcast %cst_14 : f32 to vector<8x32xf32>
    %16 = arith.maximumf %14, %15 : vector<8x32xf32>
    %17 = arith.truncf %16 : vector<8x32xf32> to vector<8x32xbf16>
    %c0_15 = arith.constant 0 : index
    %c0_16 = arith.constant 0 : index
    %18 = vector.load %arg7[%c0_15, %c0_16] : memref<32x32xbf16, #tpu.memory_space<vmem>>, vector<32x32xbf16>
    %cst_17 = arith.constant dense<0.000000e+00> : vector<8x32xf32>
    %19 = tpu.matmul %17, %18, %cst_17 {dimension_numbers = #tpu.dot_dimension_numbers<[1], [0], [0], [1], [0, 0, 1, 1], [], []>} : vector<8x32xbf16>, vector<32x32xbf16>, vector<8x32xf32> -> vector<8x32xf32>
    %c0_18 = arith.constant 0 : index
    %c0_19 = arith.constant 0 : index
    %20 = vector.load %arg8[%c0_18, %c0_19] : memref<1x32xf32, #tpu.memory_space<vmem>>, vector<1x32xf32>
    %21 = vector.broadcast %20 : vector<1x32xf32> to vector<8x32xf32>
    %22 = arith.addf %19, %21 : vector<8x32xf32>
    %cst_20 = arith.constant 0.000000e+00 : f32
    %23 = vector.broadcast %cst_20 : f32 to vector<8x32xf32>
    %24 = arith.maximumf %22, %23 : vector<8x32xf32>
    %25 = arith.truncf %24 : vector<8x32xf32> to vector<8x32xbf16>
    %c0_21 = arith.constant 0 : index
    %c0_22 = arith.constant 0 : index
    %26 = vector.load %arg9[%c0_21, %c0_22] : memref<32x16xbf16, #tpu.memory_space<vmem>>, vector<32x16xbf16>
    %cst_23 = arith.constant dense<0.000000e+00> : vector<8x16xf32>
    %27 = tpu.matmul %25, %26, %cst_23 {dimension_numbers = #tpu.dot_dimension_numbers<[1], [0], [0], [1], [0, 0, 1, 1], [], []>} : vector<8x32xbf16>, vector<32x16xbf16>, vector<8x16xf32> -> vector<8x16xf32>
    %c0_24 = arith.constant 0 : index
    %c0_25 = arith.constant 0 : index
    %28 = vector.load %arg10[%c0_24, %c0_25] : memref<1x16xf32, #tpu.memory_space<vmem>>, vector<1x16xf32>
    %29 = vector.broadcast %28 : vector<1x16xf32> to vector<8x16xf32>
    %30 = arith.addf %27, %29 : vector<8x16xf32>
    %cst_26 = arith.constant 0.000000e+00 : f32
    %31 = vector.broadcast %cst_26 : f32 to vector<8x16xf32>
    %32 = arith.maximumf %30, %31 : vector<8x16xf32>
    %33 = arith.truncf %32 : vector<8x16xf32> to vector<8x16xbf16>
    %c0_27 = arith.constant 0 : index
    %c0_28 = arith.constant 0 : index
    %34 = vector.load %arg11[%c0_27, %c0_28] : memref<16x1xbf16, #tpu.memory_space<vmem>>, vector<16x1xbf16>
    %cst_29 = arith.constant dense<0.000000e+00> : vector<8x1xf32>
    %35 = tpu.matmul %33, %34, %cst_29 {dimension_numbers = #tpu.dot_dimension_numbers<[1], [0], [0], [1], [0, 0, 1, 1], [], []>} : vector<8x16xbf16>, vector<16x1xbf16>, vector<8x1xf32> -> vector<8x1xf32>
    %c0_30 = arith.constant 0 : index
    %c0_31 = arith.constant 0 : index
    %36 = vector.load %arg12[%c0_30, %c0_31] : memref<1x1xf32, #tpu.memory_space<vmem>>, vector<1x1xf32>
    %37 = vector.broadcast %36 : vector<1x1xf32> to vector<8x1xf32>
    %38 = arith.addf %35, %37 : vector<8x1xf32>
    %39 = arith.negf %38 : vector<8x1xf32>
    %40 = math.exp %39 : vector<8x1xf32>
    %cst_32 = arith.constant 1.000000e+00 : f32
    %41 = vector.broadcast %cst_32 : f32 to vector<8x1xf32>
    %42 = arith.addf %41, %40 : vector<8x1xf32>
    %43 = arith.divf %41, %42 : vector<8x1xf32>
    %c0_33 = arith.constant 0 : index
    %c0_34 = arith.constant 0 : index
    %44 = vector.load %arg13[%c0_33, %c0_34] : memref<8x1xf32, #tpu.memory_space<vmem>>, vector<8x1xf32>
    tpu.vector_store %arg13[%c0_33, %c0_34], %43 {strides = array<i32>} : memref<8x1xf32, #tpu.memory_space<vmem>>, vector<8x1xf32>,
    return
  }
  func.func @transform_0(%arg0: i32) -> (i32, i32) {
    %c0_i32 = arith.constant 0 : i32
    %c0_i32_0 = arith.constant 0 : i32
    return %arg0, %c0_i32 : i32, i32
  }
  func.func @transform_1(%arg0: i32) -> (i32, i32) {
    %c0_i32 = arith.constant 0 : i32
    %c0_i32_0 = arith.constant 0 : i32
    %c0_i32_1 = arith.constant 0 : i32
    return %c0_i32, %c0_i32_0 : i32, i32
  }
  func.func @transform_2(%arg0: i32) -> (i32, i32) {
    %c0_i32 = arith.constant 0 : i32
    %c0_i32_0 = arith.constant 0 : i32
    %c0_i32_1 = arith.constant 0 : i32
    return %c0_i32, %c0_i32_0 : i32, i32
  }
  func.func @transform_3(%arg0: i32) -> (i32, i32) {
    %c0_i32 = arith.constant 0 : i32
    %c0_i32_0 = arith.constant 0 : i32
    %c0_i32_1 = arith.constant 0 : i32
    return %c0_i32, %c0_i32_0 : i32, i32
  }
  func.func @transform_4(%arg0: i32) -> (i32, i32) {
    %c0_i32 = arith.constant 0 : i32
    %c0_i32_0 = arith.constant 0 : i32
    %c0_i32_1 = arith.constant 0 : i32
    return %c0_i32, %c0_i32_0 : i32, i32
  }
  func.func @transform_5(%arg0: i32) -> (i32, i32) {
    %c0_i32 = arith.constant 0 : i32
    %c0_i32_0 = arith.constant 0 : i32
    %c0_i32_1 = arith.constant 0 : i32
    return %c0_i32, %c0_i32_0 : i32, i32
  }
  func.func @transform_6(%arg0: i32) -> (i32, i32) {
    %c0_i32 = arith.constant 0 : i32
    %c0_i32_0 = arith.constant 0 : i32
    %c0_i32_1 = arith.constant 0 : i32
    return %c0_i32, %c0_i32_0 : i32, i32
  }
  func.func @transform_7(%arg0: i32) -> (i32, i32) {
    %c0_i32 = arith.constant 0 : i32
    %c0_i32_0 = arith.constant 0 : i32
    %c0_i32_1 = arith.constant 0 : i32
    return %c0_i32, %c0_i32_0 : i32, i32
  }
  func.func @transform_8(%arg0: i32) -> (i32, i32) {
    %c0_i32 = arith.constant 0 : i32
    %c0_i32_0 = arith.constant 0 : i32
    %c0_i32_1 = arith.constant 0 : i32
    return %c0_i32, %c0_i32_0 : i32, i32
  }
  func.func @transform_9(%arg0: i32) -> (i32, i32) {
    %c0_i32 = arith.constant 0 : i32
    %c0_i32_0 = arith.constant 0 : i32
    %c0_i32_1 = arith.constant 0 : i32
    return %c0_i32, %c0_i32_0 : i32, i32
  }
  func.func @transform_10(%arg0: i32) -> (i32, i32) {
    %c0_i32 = arith.constant 0 : i32
    %c0_i32_0 = arith.constant 0 : i32
    %c0_i32_1 = arith.constant 0 : i32
    return %c0_i32, %c0_i32_0 : i32, i32
  }
  func.func @transform_11(%arg0: i32) -> (i32, i32) {
    %c0_i32 = arith.constant 0 : i32
    %c0_i32_0 = arith.constant 0 : i32
    %c0_i32_1 = arith.constant 0 : i32
    return %c0_i32, %c0_i32_0 : i32, i32
  }
  func.func @transform_12(%arg0: i32) -> (i32, i32) {
    %c0_i32 = arith.constant 0 : i32
    %c0_i32_0 = arith.constant 0 : i32
    return %arg0, %c0_i32 : i32, i32
  }
}

</mosaic_0001>

<bundles_post_ra>
// kernel: tpu_custom_call.1
= control target key start
LH: loop header
LB: loop body
LE: loop exit
PB: predicated region body
PF: predicated region fallthrough
CT: control target
= control target key end

     0   :  { %vm69_vm0 = vcmask 1043456   ;;  %vm65_vm1 = vcmask 326656   ;;  %vm169_vm2 = vcmask 654336   ;;  %vm244_vm3 = vcmask 261120   ;;  %s591_s1 = inlined_call_operand.vmem [shape: bf16[40,80], index: 1, kind: input, shape index: {}]   ;;  %s592_s2 = inlined_call_operand.vmem [shape: bf16[40,80], index: 2, kind: input, shape index: {}]   ;;  %s593_s4 = inlined_call_operand.vmem [shape: bf16[80,32], index: 4, kind: input, shape index: {}]   ;;  %s594_s3 = inlined_call_operand.vmem [shape: bf16[40,32], index: 3, kind: input, shape index: {}]   ;;  %s595_s0 = inlined_call_operand.vmem [shape: bf16[8,40], index: 0, kind: input, shape index: {}]   ;;  %s596_s5 = inlined_call_operand.vmem [shape: f32[1,32], index: 5, kind: input, shape index: {}]   ;;  %s597_s6 = inlined_call_operand.vmem [shape: bf16[32,32], index: 6, kind: input, shape index: {}]   ;;  %s598_s7 = inlined_call_operand.vmem [shape: f32[1,32], index: 7, kind: input, shape index: {}]   ;;  %s599_s8 = inlined_call_operand.vmem [shape: bf16[32,16], index: 8, kind: input, shape index: {}]   ;;  %s600_s9 = inlined_call_operand.vmem [shape: f32[1,16], index: 9, kind: input, shape index: {}]   ;;  %s601_s10 = inlined_call_operand.vmem [shape: bf16[16,1], index: 10, kind: input, shape index: {}]   ;;  %s602_s11 = inlined_call_operand.<no memory space> [shape: f32[1,1], index: 11, kind: input, shape index: {}]   ;;  %s603_s12 = inlined_call_operand.vmem [shape: f32[8,1], index: 12, kind: output, shape index: {}]  }
   0x1   :  { %v49_v0 = vld [vmem:[%s591_s1 + $0x10] sm:$0xf]  ;;  %v437_v4 = vld [vmem:[%s593_s4 + $0x20] sm:$0xff]  ;;  %v436_v9 = vld [vmem:[%s593_s4 + $0x18] sm:$0xff]  ;;  %v17_v50 = vstv %s602_s11  ;;  %vm313_vm4 = vcmask 130048   ;;  %vm349_vm8 = vcmask 7168  }
   0x2   :  { %v90_v1 = vld [vmem:[%s592_s2 + $0x10] sm:$0xf]  ;;  %v59_v2 = vunpack.c.l.b16 %v49_v0  ;;  %176 = vmatpush.bf16.msra.mxu2 %v437_v4  ;;  %v428_v13 = vld [vmem:[%s591_s1 + $0x8] sm:$0xff]  ;;  %v427_v18 = vld [vmem:[%s591_s1] sm:$0xff]  ;;  %18 = vst [vmem:[#allocation2] sm:$0x1] %v17_v50 }
   0x3   :  { %v100_v3 = vunpack.c.l.b16 %v90_v1  ;;  %v128_v5 = vld [vmem:[%s594_s3 + $0x10] sm:$0xf]  ;;  %v430_v14 = vld [vmem:[%s592_s2 + $0x8] sm:$0xff]  ;;  %v429_v19 = vld [vmem:[%s592_s2] sm:$0xff] }
   0x4   :  { %v62_v6 = vpack.c.b16 %v59_v2, %v59_v2  ;;  %v195_v8 = vunpack.c.l.b16 %v128_v5  ;;  %v432_v16 = vld [vmem:[%s594_s3 + $0x8] sm:$0xff]  ;;  %v435_v17 = vld [vmem:[%s593_s4 + $0x10] sm:$0xff]  ;;  %v431_v20 = vld [vmem:[%s594_s3] sm:$0xff] }
   0x5   :  { %v103_v7 = vpack.c.b16 %v100_v3, %v100_v3  ;;  %v434_v21 = vld [vmem:[%s593_s4 + $0x8] sm:$0xff]  ;;  %v44_v22 = vld [vmem:[%s595_s0] sm:$0xf] }
   0x6   :  { %v71_v10 = vsel %vm69_vm0, %v62_v6, 0  ;;  %v198_v12 = vpack.c.b16 %v195_v8, %v195_v8  ;;  %177 = vmatpush.bf16.msra.mxu2 %v436_v9  ;;  %v433_v23 = vld [vmem:[%s593_s4] sm:$0xff]  ;;  %v439_v24 = vld [vmem:[%s597_s6 + $0x8] sm:$0xff] }
   0x7   :  { %v107_v11 = vsel %vm69_vm0, %v103_v7, 0  ;;  %78 = vmatpush.bf16.msra.mxu0 %v71_v10  ;;  %v438_v33 = vld [vmem:[%s597_s6] sm:$0xff]  ;;  %v441_v34 = vld [vmem:[%s599_s8 + $0x8] sm:$0xff] }
   0x8   :  { %114 = vmatpush.bf16.msra.mxu1 %v107_v11  ;;  %v202_v15 = vsel %vm69_vm0, %v198_v12, 0  ;;  %v440_v35 = vld [vmem:[%s599_s8] sm:$0xff] }
   0x9   :  { %209 = vmatpush.bf16.msra.mxu3 %v202_v15  ;;  %v443_v36 = vld [vmem:[%s596_s5] ss:$0 sm:$0xff] }
   0xa   :  { %178 = vmatpush.bf16.msra.mxu2 %v435_v17  ;;  %v442_v43 = vld [vmem:[%s601_s10] sm:$0xff] }
   0xb   :  { %79 = vmatpush.bf16.msra.mxu0 %v428_v13  ;;  %v444_v44 = vld [vmem:[%s598_s7] ss:$0 sm:$0xff] }
   0xc   :  { %115 = vmatpush.bf16.msra.mxu1 %v430_v14  ;;  %v445_v51 = vld [vmem:[%s600_s9] ss:$0 sm:$0xff] }
   0xd   :  { %210 = vmatpush.bf16.msra.mxu3 %v432_v16  ;;  %v446_v57 = vld [vmem:[#allocation2] ss:$0 sm:$0xff] }
   0xe   :  { %179 = vmatpush.bf16.msra.mxu2 %v434_v21 }
   0xf   :  { %80 = vmatpush.bf16.msra.mxu0 %v427_v18 }
  0x10   :  { %116 = vmatpush.bf16.msra.mxu1 %v429_v19 }
  0x11   :  { %211 = vmatpush.bf16.msra.mxu3 %v431_v20 }
  0x12   :  { %363 = vmatmul.msk.bf16.vlgmr.msra.gmra.mxu0 %vm65_vm1, %v44_v22  ;;  %180 = vmatpush.bf16.msra.mxu2 %v433_v23 }
  0x13   :  { %372 = vmatmul.msk.bf16.vlgmr.msra.gmra.mxu1 %vm65_vm1, %v44_v22  ;;  %254 = vmatpush.bf16.msrb.mxu0 %v439_v24 }
  0x14   :  { %402 = vmatmul.msk.bf16.vlgmr.msra.gmra.mxu3 %vm65_vm1, %v44_v22  ;;  %292 = vmatpush.bf16.msrb.mxu1 %v441_v34 }
  0x15   :  { %324 = vmatpush.bf16.msrb.mxu3 %v442_v43 }
  0x17   :  { %255 = vmatpush.bf16.msrb.mxu0 %v438_v33 }
  0x18   :  { %293 = vmatpush.bf16.msrb.mxu1 %v440_v35 }
  0x8f   :  { %v82_v25 = vpop.f32.mrf.mxu0 }
  0x90   :  { %v118_v26 = vpop.f32.mrf.mxu1 }
  0x91   :  { %v122_v27 = vmul.f32 %v118_v26, %v82_v25 }
  0x93   :  { %v123_v28 = vpack.c.bf16 %v122_v27, %v122_v27 }
  0x95   :  { %393 = vmatmul.msk.bf16.vlgmr.msra.gmra.mxu2 %vm169_vm2, %v123_v28 }
  0x97   :  { %v84_v29 = vpop.f32.mrf.mxu0  ;;  %v213_v31 = vpop.f32.mrf.mxu3 }
  0x98   :  { %v120_v30 = vpop.f32.mrf.mxu1 }
  0x9f   :  { %v215_v32 = vpop.f32.mrf.mxu3 }
 0x118   :  { %v182_v37 = vpop.f32.mrf.mxu2 }
 0x119   :  { %v214_v38 = vadd.f32 %v213_v31, %v182_v37 }
 0x11b   :  { %v221_v39 = vadd.f32 %v443_v36, %v214_v38 }
 0x11d   :  { %v222_v40 = vmax.f32 %v221_v39, 0.0 }
 0x11f   :  { %v223_v41 = vpack.c.bf16 %v222_v40, %v222_v40 }
 0x120   :  { %v184_v42 = vpop.f32.mrf.mxu2 }
 0x121   :  { %411 = vmatmul.msk.bf16.vlgmr.msrb.gmra.mxu0 %vm244_vm3, %v223_v41 }
 0x19e   :  { %v257_v45 = vpop.f32.mrf.mxu0 }
 0x19f   :  { %v258_v46 = vadd.f32 %v444_v44, %v257_v45 }
 0x1a1   :  { %v261_v47 = vmax.f32 %v258_v46, 0.0 }
 0x1a3   :  { %v262_v48 = vpack.c.bf16 %v261_v47, %v261_v47 }
 0x1a5   :  { %420 = vmatmul.msk.bf16.vlgmr.msrb.gmra.mxu1 %vm244_vm3, %v262_v48 }
 0x1a6   :  { %v259_v49 = vpop.f32.mrf.mxu0 }
 0x222   :  { %v295_v52 = vpop.f32.mrf.mxu1 }
 0x223   :  { %v296_v53 = vadd.f32 %v445_v51, %v295_v52 }
 0x225   :  { %v299_v54 = vmax.f32 %v296_v53, 0.0 }
 0x227   :  { %v300_v55 = vpack.c.bf16 %v299_v54, %v299_v54 }
 0x229   :  { %425 = vmatmul.msk.bf16.vlgmr.msrb.gmra.mxu3 %vm313_vm4, %v300_v55 }
 0x22a   :  { %v297_v56 = vpop.f32.mrf.mxu1 }
 0x2ac   :  { %v326_v58 = vpop.f32.mrf.mxu3 }
 0x2ad   :  { %v327_v59 = vadd.f32 %v446_v57, %v326_v58 }
 0x2af   :  { %v426_v60 = vmul.f32 -1.442695, %v327_v59 }
 0x2b1   :  { %447 = vpow2.f32 %v426_v60 }
 0x2b4   :  { %v328_v61 = vpop.f32.mrf.mxu3 }
 0x2b7   :  { %v448_v62 = vpop.eup %447 }
 0x2b8   :  { %v333_v63 = vadd.f32 1.0, %v448_v62 }
 0x2ba   :  { %449 = vrcp.f32 %v333_v63  ;;  %v345_v3 = vand.u32 2147483648, %v333_v63  ;;  %v343_v5 = vand.u32 2147483647, %v333_v63  ;;  %vm339_vm6 = vweird.f32 %v333_v63 }
 0x2bc   :  { %v346_v7 = vor.u32 1.1754944e-38, %v345_v3  ;;  %vm344_vm9 = vcmp.eq.f32.partialorder %v343_v5, 8.507059e+37 }
 0x2c0   :  { %v450_v0 = vpop.eup %449 }
 0x2c1   :  { %v335_v1 = vmul.f32 %v450_v0, %v333_v63  ;;  %vm340_vm5 = vweird.f32 %v450_v0 }
 0x2c2   :  { %vm341_vm7 = vmor %vm339_vm6, %vm340_vm5 }
 0x2c3   :  { %v336_v2 = vsub.f32 1.0, %v335_v1 }
 0x2c5   :  { %v337_v4 = vmul.f32 %v450_v0, %v336_v2 }
 0x2c7   :  { %v338_v6 = vadd.f32 %v450_v0, %v337_v4 }
 0x2c9   :  { %v342_v8 = vsel %vm341_vm7, %v450_v0, %v338_v6 }
 0x2ca   :  { %v347_v9 = vsel %vm344_vm9, %v346_v7, %v342_v8 }
 0x2cb   :  { %350 = vst.msk [vmem:[%s603_s12] sm:$0xff] %vm349_vm8, %v347_v9 }

</bundles_post_ra>
